<compile_context>
chip_gen: v7x
topology: tpu7x:2x2x1
jax: 0.10.0
libtpu: 0.0.40
codegen_flags: <defaults>
</compile_context>

<pallas_src>
import functools

import jax
import jax.numpy as jnp
from jax import lax
from jax.experimental import pallas as pl
from jax.experimental.pallas import tpu as pltpu

LANES = 128
_TARGET_BLOCK_BYTES = 4 * 1024 * 1024     # ~4 MiB per input block
_VMEM_LIMIT_BYTES = 32 * 1024 * 1024      # safe on v5e/v6e/v7x


def _mse_partial_kernel(a_ref, b_ref, out_ref, *, tile, group, tail_rows):
    """Write the (8, 128) f32 partial sum of (a-b)^2 for this grid block."""

    def group_sum(r0, nrows):  # nrows: static multiple of 8
        av = a_ref[pl.ds(r0, nrows), :].astype(jnp.float32)
        bv = b_ref[pl.ds(r0, nrows), :].astype(jnp.float32)
        d = av - bv
        # (nrows,128) -> (nrows//8, 8, 128) is a vreg-wise relabel; the axis-0
        # sum is pure VPU adds (no XLU traffic).
        return jnp.sum((d * d).reshape(nrows // 8, 8, LANES), axis=0)

    def sum_rows(nrows):  # static nrows (multiple of 8)
        full = nrows // group
        rem = nrows - full * group
        acc = jnp.zeros((8, LANES), jnp.float32)
        if full > 0:
            def body(j, a):
                r0 = pl.multiple_of(j * group, group)
                return a + group_sum(r0, group)
            acc = lax.fori_loop(0, full, body, acc, unroll=min(4, full))
        if rem > 0:
            acc = acc + group_sum(full * group, rem)
        return acc

    if tail_rows == 0:
        # Every block is full: single clean path, no masking anywhere.
        out_ref[...] = sum_rows(tile)
    else:
        # Only the last grid step has a partial block; interior blocks pay
        # nothing extra for it.
        is_last = pl.program_id(0) == pl.num_programs(0) - 1

        @pl.when(jnp.logical_not(is_last))
        def _():
            out_ref[...] = sum_rows(tile)

        @pl.when(is_last)
        def _():
            out_ref[...] = sum_rows(tail_rows)


def consistency_loss(logit1, logit2, *, min_kernel_bytes: int = 1 << 20):
    """MSE(logit1, logit2) with mean reduction (matches nn.MSELoss())."""
    assert logit1.shape == logit2.shape, "shapes must match (as in the torch module)"

    # Explicit promotion policy for mixed dtypes (review concern).
    common = jnp.promote_types(logit1.dtype, logit2.dtype)
    if logit1.dtype != common:
        logit1 = logit1.astype(common)
    if logit2.dtype != common:
        logit2 = logit2.astype(common)

    n = logit1.size
    itemsize = jnp.dtype(common).itemsize
    # Dtype-aware sublane granularity: 8 rows f32, 16 bf16, 32 int8/fp8.
    sub = 8 * max(1, 4 // itemsize)
    chunk = sub * LANES

    a = logit1.reshape(-1)   # contiguous reshape: free
    b = logit2.reshape(-1)

    aligned = (n // chunk) * chunk
    if n * itemsize < min_kernel_bytes or aligned == 0:
        # Small-input fast path: kernel launch + epilogue would dominate.
        d = a.astype(jnp.float32) - b.astype(jnp.float32)
        return jnp.sum(d * d) * (1.0 / float(n))

    rows = aligned // LANES                      # multiple of `sub`

    # Tile selection: ~4 MiB/input blocks, multiple of `sub`, and an even
    # block count (>= 2 when possible) so both v7x TensorCores get work.
    tile_target = max(sub, (_TARGET_BLOCK_BYTES // (LANES * itemsize)) // sub * sub)
    desired_blocks = pl.cdiv(rows, tile_target)
    if desired_blocks == 1:
        if rows >= 2 * sub:
            desired_blocks = 2
    elif desired_blocks % 2 == 1:
        desired_blocks += 1
    tile = pl.cdiv(rows, desired_blocks)
    tile = min(rows, pl.cdiv(tile, sub) * sub)   # round up to `sub` multiple
    num_blocks = pl.cdiv(rows, tile)
    tail_rows = rows - (num_blocks - 1) * tile   # valid rows in the last block
    if tail_rows == tile:
        tail_rows = 0                            # all blocks full
    group = min(8 * sub, tile)                   # rows per fori_loop iteration

    a2 = a[:aligned].reshape(rows, LANES)
    b2 = b[:aligned].reshape(rows, LANES)
    # TODO(synk): for ragged n the prefix slice may materialize a copy; a fully
    # copy-free ragged tail would need a manual-DMA (pl.ANY) variant.

    in_bytes = 2 * aligned * itemsize
    out_bytes = num_blocks * 8 * LANES * 4

    partials = pl.pallas_call(
        functools.partial(_mse_partial_kernel,
                          tile=tile, group=group, tail_rows=tail_rows),
        out_shape=jax.ShapeDtypeStruct((num_blocks * 8, LANES), jnp.float32),
        grid=(num_blocks,),
        in_specs=[
            pl.BlockSpec((tile, LANES), lambda i: (i, 0)),
            pl.BlockSpec((tile, LANES), lambda i: (i, 0)),
        ],
        out_specs=pl.BlockSpec((8, LANES), lambda i: (i, 0)),
        compiler_params=pltpu.CompilerParams(
            dimension_semantics=("parallel",),        # no carried state
            vmem_limit_bytes=_VMEM_LIMIT_BYTES,
        ),
        cost_estimate=pl.CostEstimate(
            flops=3 * aligned, transcendentals=0,
            bytes_accessed=in_bytes + out_bytes,
        ),
    )(a2, b2)

    total = jnp.sum(partials)
    if aligned < n:
        # Ragged element tail (< chunk elements): plain JAX, no jnp.pad copies.
        dt = a[aligned:].astype(jnp.float32) - b[aligned:].astype(jnp.float32)
        total = total + jnp.sum(dt * dt)
    return total * (1.0 / float(n))


if __name__ == "__main__":
    key = jax.random.PRNGKey(0)
    k1, k2 = jax.random.split(key)

    # Small shapes consistent with "logits": [B, C, H, W] = [2, 4, 16, 16]
    logit1 = jax.random.normal(k1, (2, 4, 16, 16), dtype=jnp.float32)
    logit2 = jax.random.normal(k2, (2, 4, 16, 16), dtype=jnp.float32)
    ref = jnp.mean((logit1 - logit2) ** 2)

    # Force the Pallas kernel path (the default heuristic would route this tiny
    # input to the plain-XLA fast path).
    loss = jax.block_until_ready(consistency_loss(logit1, logit2, min_kernel_bytes=0))
    assert jnp.allclose(loss, ref, rtol=1e-6, atol=1e-6), (loss, ref)

    # Default path (small-input fast path) must agree too.
    loss_fast = jax.block_until_ready(consistency_loss(logit1, logit2))
    assert jnp.allclose(loss_fast, ref, rtol=1e-6, atol=1e-6), (loss_fast, ref)

    # Ragged size exercising the plain-JAX tail + partial-last-block kernel path.
    a = jax.random.normal(k1, (4, 5, 16, 17), dtype=jnp.float32)
    b = jax.random.normal(k2, (4, 5, 16, 17), dtype=jnp.float32)
    l2 = jax.block_until_ready(consistency_loss(a, b, min_kernel_bytes=0))
    r2 = jnp.mean((a - b) ** 2)
    assert jnp.allclose(l2, r2, rtol=1e-5, atol=1e-6), (l2, r2)

    # bf16 path (dtype-aware 16-row sublane granularity).
    a16, b16 = a.astype(jnp.bfloat16), b.astype(jnp.bfloat16)
    l3 = jax.block_until_ready(consistency_loss(a16, b16, min_kernel_bytes=0))
    r3 = jnp.mean((a16.astype(jnp.float32) - b16.astype(jnp.float32)) ** 2)
    assert jnp.allclose(l3, r3, rtol=1e-3, atol=1e-4), (l3, r3)

    print("KERNEL_OK")
</pallas_src>

<mosaic_0001>
module attributes {stable_mosaic.version = 11 : i64} {
  func.func @_mse_partial_kernel(%arg0: i32, %arg1: memref<8x128xf32, #tpu.memory_space<vmem>>, %arg2: memref<8x128xf32, #tpu.memory_space<vmem>>, %arg3: memref<8x128xf32, #tpu.memory_space<vmem>>) attributes {dimension_semantics = [#tpu.dimension_semantics<parallel>], iteration_bounds = array<i64: 2>, scalar_prefetch = 0 : i64, scratch_operands = 0 : i64, tpu.core_type = #tpu.core_type<tc>, window_params = [{transform_indices = @transform_0, window_bounds = array<i64: 8, 128>}, {transform_indices = @transform_1, window_bounds = array<i64: 8, 128>}, {transform_indices = @transform_2, window_bounds = array<i64: 8, 128>}]} {
    %cst = arith.constant 0.000000e+00 : f32
    %0 = vector.broadcast %cst : f32 to vector<8x128xf32>
    %c0_i32 = arith.constant 0 : i32
    %c8_i32 = arith.constant 8 : i32
    %1 = arith.muli %c0_i32, %c8_i32 : i32
    %2 = tpu.assume_multiple %1, 8 : i32
    %3 = arith.index_cast %2 : i32 to index
    %c0 = arith.constant 0 : index
    %4 = vector.load %arg1[%3, %c0] : memref<8x128xf32, #tpu.memory_space<vmem>>, vector<8x128xf32>
    %5 = arith.index_cast %2 : i32 to index
    %c0_0 = arith.constant 0 : index
    %6 = vector.load %arg2[%5, %c0_0] : memref<8x128xf32, #tpu.memory_space<vmem>>, vector<8x128xf32>
    %7 = arith.subf %4, %6 : vector<8x128xf32>
    %8 = arith.mulf %7, %7 : vector<8x128xf32>
    %9 = vector.shape_cast %8 : vector<8x128xf32> to vector<1x8x128xf32>
    %cst_1 = arith.constant dense<0.000000e+00> : vector<8x128xf32>
    %10 = vector.multi_reduction <add>, %9, %cst_1 [0] : vector<1x8x128xf32> to vector<8x128xf32>
    %11 = arith.addf %0, %10 : vector<8x128xf32>
    %c1_i32 = arith.constant 1 : i32
    %c0_2 = arith.constant 0 : index
    %c0_3 = arith.constant 0 : index
    %12 = vector.load %arg3[%c0_2, %c0_3] : memref<8x128xf32, #tpu.memory_space<vmem>>, vector<8x128xf32>
    tpu.vector_store %arg3[%c0_2, %c0_3], %11 {strides = array<i32>} : memref<8x128xf32, #tpu.memory_space<vmem>>, vector<8x128xf32>,
    return
  }
  func.func @transform_0(%arg0: i32) -> (i32, i32) {
    %c0_i32 = arith.constant 0 : i32
    %c0_i32_0 = arith.constant 0 : i32
    return %arg0, %c0_i32 : i32, i32
  }
  func.func @transform_1(%arg0: i32) -> (i32, i32) {
    %c0_i32 = arith.constant 0 : i32
    %c0_i32_0 = arith.constant 0 : i32
    return %arg0, %c0_i32 : i32, i32
  }
  func.func @transform_2(%arg0: i32) -> (i32, i32) {
    %c0_i32 = arith.constant 0 : i32
    %c0_i32_0 = arith.constant 0 : i32
    return %arg0, %c0_i32 : i32, i32
  }
}

</mosaic_0001>

<bundles_post_ra>
// kernel: tpu_custom_call.1
= control target key start
LH: loop header
LB: loop body
LE: loop exit
PB: predicated region body
PF: predicated region fallthrough
CT: control target
= control target key end

     0   :  { %7 = vsyncpa [#allocation3], 0  ;;  %s735_s0 = inlined_call_operand.hbm [shape: f32[16,128], index: 0, kind: input, shape index: {}]   ;;  %s736_s1 = inlined_call_operand.hbm [shape: f32[16,128], index: 1, kind: input, shape index: {}]   ;;  %s737_s2 = inlined_call_operand.hbm [shape: f32[16,128], index: 2, kind: output, shape index: {}]  }
   0x1   :  { %9 = vsyncpa [#allocation3 + $0x1], 0 }
   0x2   :  { %10 = vsyncpa [#allocation6], 0 }
   0x3   :  { %12 = vsyncpa [#allocation6 + $0x1], 0 }
   0x4   :  { %13 = vsyncpa [#allocation4], 0 }
   0x5   :  { %15 = vsyncpa [#allocation4 + $0x1], 0  ;;  %s526_s9 = smov 0   ;;  %s528_s10 = smov 0  }
   0x6   :  { %s530_s11 = smov 0   ;;  %s532_s12 = smov 0  }
   0x7 LB: > { %s547_s13 = sadd.s32 4294967295, %s506_s12   ;;  %s310_s14 = sadd.s32 4294967294, %s506_s12   ;;  %s506_s12 = sphi %s532_s12, %s756_s12   ;;  %s502_s11 = sphi %s530_s11, %s755_s11   ;;  %s498_s10 = sphi %s528_s10, %s754_s10   ;;  %s494_s9 = sphi %s526_s9, %s753_s9  }
   0x8   : > { %s551_s15 = sadd.s32 1, %s506_s12   ;;  %s28_s16 = sadd.s32 1, %s502_s11 }
   0x9   : > { %s25_s17 = ssub.s32 %s506_s12, %s551_s15  ;;  %p35_p0 = scmp.ne.s32.totalorder %s502_s11, %s498_s10 }
   0xa   : > { %p26_p1 = scmp.eq.s32.totalorder %s25_s17, 0  ;;  %p36_p2 = scmp.eq.s32.totalorder %s506_s12, 0 }
   0xb   : > { %p41_p3 = scmp.ne.s32.totalorder %s498_s10, %s494_s9  ;;  %p42_p4 = scmp.eq.s32.totalorder %s547_s13, 0 }
   0xc   : > { %s563_s18 = scalar_select %p26_p1, %s502_s11, %s28_s16  }
   0xd   : > { %p565_p5 = por %p36_p2, %p35_p0  ;;  %p569_p6 = por %p42_p4, %p41_p3 }
   0xe   : > { %p91_p7 = scmp.eq.s32.totalorder %s547_s13, 1  ;;  %p97_p8 = scmp.eq.s32.totalorder %s310_s14, 1 }
   0xf   : > { %s741_s20 = scalar_select %p569_p6, 1, 0 }
  0x10   : > { %p342_p10 = scmp.lt.s32.totalorder %s506_s12, 2  ;;  %p576_p11 = por %p91_p7, %p35_p0 }
  0x11   : > { %p580_p12 = por %p97_p8, %p41_p3  ;;  %s585_s23 = sand.u32 1, %s502_s11  }
  0x12   : > { %s742_s21 = scalar_select %p576_p11, 1, 0 }
  0x13   : > { %s743_s22 = scalar_select %p580_p12, 1, 0 }
  0x14   : > { %s314_s24 = sshll.u32 %s506_s12, 7  ;;  %s313_s25 = sshll.u32 %s585_s23, 3 }
  0x15   : > { %s594_s28 = scalar_lea.hbm %s735_s0, %s314_s24  ;;  %s121_s29 = scalar_lea.vmem [#allocation2], %s313_s25 }
  0x16   : > { %s128_s30 = sshll.u32 %s121_s29, 4  ;;  %p600_p13 = pnand %p342_p10, %p565_p5  ;;  %s604_s30 = int_to_ptr.vmem [resolvable:$true] %s128_s30 }
  0x17   : > { %s118_s4 = scalar_lea.sflag [#allocation3], %s585_s23  ;;  %s376_s5 = scalar_lea.hbm %s594_s28, 128 }
  0x18   : > { %p377_p2 = scmp.ne.s32.totalorder %s594_s28, %s376_s5  ;;  %p378_p3 = pneg %p600_p13 }
  0x19   : > { %s381_s8 = scalar_lea.hbm %s735_s0, 256  ;;  %p382_p5 = scmp.lt.u32.totalorder %s594_s28, %s735_s0 }
  0x1a   : > { %p379_p4 = pnand %p378_p3, %p377_p2  ;;  %p383_p8 = scmp.lt.u32.totalorder %s381_s8, %s376_s5 }
  0x1b   : > { %p385_p9 = scmp.lt.u32.totalorder %s376_s5, %s594_s28 }
  0x1c   : > { %p380_p7 = pneg %p379_p4  ;;  %p384_p10 = por %p383_p8, %p382_p5 }
  0x1e   : > { %p386_p0 = por %p385_p9, %p384_p10 }
  0x20   : > { %p387_p1 = pnand %p386_p0, %p380_p7 }
  0x22   : > { %390 = shalt.err (!%p387_p1)
}
  0x23   : > { %s391_s17 = scalar_lea.vmem %s604_s30, 128  ;;  %s508_s19 = smov [#allocation2]  }
  0x24   : > { %p392_p2 = scmp.ne.s32.totalorder %s604_s30, %s391_s17  ;;  %s396_s26 = sshll.u32 %s508_s19, 4  ;;  %s397_s26 = int_to_ptr.vmem [resolvable:$false] %s396_s26 }
  0x25   : > { %s398_s27 = scalar_lea.vmem %s397_s26, 256  ;;  %p399_p11 = scmp.lt.s32.totalorder %s604_s30, %s397_s26 }
  0x26   : > { %p394_p4 = pnand %p392_p2, %p378_p3  ;;  %p400_p5 = scmp.lt.s32.totalorder %s398_s27, %s391_s17 }
  0x28   : > { %p395_p12 = pneg %p394_p4  ;;  %p401_p8 = por %p400_p5, %p399_p11 }
  0x2a   : > { %p402_p9 = pnand %p401_p8, %p395_p12 }
  0x2c   : > { %405 = shalt.err (!%p402_p9)
}
  0x2d   : > { %334 = dma.hbm_to_vmem [thread:$0]  (!%p600_p13), %s594_s28, 128, %s604_s30, %s118_s4  }
  0x2e   : > { %p745_p0 = scmp.lt.s32.totalorder %s506_s12, 3  ;;  %p746_p1 = scmp.ge.s32.totalorder %s506_s12, 1 }
  0x2f   : > { %s647_s7 = scalar_lea.hbm %s736_s1, %s314_s24  ;;  %s139_s8 = scalar_lea.vmem [#allocation5], %s313_s25 }
  0x30   : > { %p638_p7 = pnand %p746_p1, %p745_p0  ;;  %s146_s14 = sshll.u32 %s139_s8, 4  ;;  %s147_s14 = int_to_ptr.vmem [resolvable:$true] %s146_s14 }
  0x31   : > { %s136_s28 = scalar_lea.sflag [#allocation6], %s585_s23  ;;  %s406_s30 = scalar_lea.hbm %s647_s7, 128 }
  0x32   : > { %s747_s29 = scalar_select %p638_p7, 1, 0 }
  0x33   : > { %p407_p11 = scmp.ne.s32.totalorder %s647_s7, %s406_s30  ;;  %s411_s24 = scalar_lea.hbm %s736_s1, 256 }
  0x34   : > { %p412_p2 = scmp.lt.u32.totalorder %s647_s7, %s736_s1  ;;  %p413_p4 = scmp.lt.u32.totalorder %s411_s24, %s406_s30 }
  0x35   : > { %p409_p12 = pnand %p407_p11, %p378_p3  ;;  %p415_p8 = scmp.lt.u32.totalorder %s406_s30, %s647_s7 }
  0x36   : > { %p414_p5 = por %p413_p4, %p412_p2 }
  0x37   : > { %p410_p10 = pneg %p409_p12 }
  0x38   : > { %p416_p9 = por %p415_p8, %p414_p5 }
  0x3a   : > { %p417_p0 = pnand %p416_p9, %p410_p10 }
  0x3c   : > { %420 = shalt.err (!%p417_p0)
}
  0x3d   : > { %s421_s23 = scalar_lea.vmem %s147_s14, 128  ;;  %s509_s25 = smov [#allocation5]  }
  0x3e   : > { %p422_p1 = scmp.ne.s32.totalorder %s147_s14, %s421_s23  ;;  %s426_s26 = sshll.u32 %s509_s25, 4  ;;  %s427_s26 = int_to_ptr.vmem [resolvable:$false] %s426_s26 }
  0x3f   : > { %s428_s27 = scalar_lea.vmem %s427_s26, 256  ;;  %p429_p6 = scmp.lt.s32.totalorder %s147_s14, %s427_s26 }
  0x40   : > { %p424_p11 = pnand %p422_p1, %p378_p3  ;;  %p430_p7 = scmp.lt.s32.totalorder %s428_s27, %s421_s23 }
  0x42   : > { %p425_p12 = pneg %p424_p11  ;;  %p431_p2 = por %p430_p7, %p429_p6 }
  0x44   : > { %p432_p4 = pnand %p431_p2, %p425_p12 }
  0x46   : > { %435 = shalt.err (!%p432_p4)
}
  0x47   : > { %337 = dma.hbm_to_vmem [thread:$0]  (!%p600_p13), %s647_s7, 128, %s147_s14, %s136_s28  }
  0x48   : > { %p748_p10 = scmp.ne.s32.totalorder %s747_s29, 0 }
  0x49   : > { %s674_s5 = sand.u32 (!%p748_p10), 1, %s498_s10   ;;  %p749_p3 = scmp.ne.s32.totalorder (!%p748_p10), %s741_s20, 0 }
  0x4a   : > { %155 = sbr.rel (%p748_p10) target bundleno = 110 (0x6e), region = 28  ;;  %s318_s6 = sshll.u32 (!%p748_p10), %s674_s5, 3 }
  0x4b   : > { %s158_s8 = scalar_lea.sflag (!%p748_p10), [#allocation3], %s674_s5  ;;  %s161_s30 = scalar_lea.vmem (!%p748_p10), [#allocation2], %s318_s6 }
  0x51   : > { %481 = dma.done.wait (%p749_p3), %s158_s8, 128  }
  0x52   : > { %483 = vsyncadd (%p749_p3), %s158_s8, 4294967168  ;;  %s167_s3 = scalar_lea.sflag [#allocation6], %s674_s5  ;;  %s170_s7 = scalar_lea.vmem [#allocation5], %s318_s6 }
  0x53   : > { %485 = dma.done.wait (%p749_p3), %s167_s3, 128  }
  0x54   : > { %487 = vsyncadd (%p749_p3), %s167_s3, 4294967168  ;;  %v196_v0 = vld [vmem:[%s161_s30] sm:$0xff]  ;;  %v197_v1 = vld [vmem:[%s170_s7] sm:$0xff]  ;;  %s195_s29 = scalar_lea.vmem [#allocation7], %s318_s6  ;;  %s322_s28 = sshll.u32 %s547_s13, 7 }
  0x55   : > { %s217_s14 = sshll.u32 %s195_s29, 4  ;;  %v198_v2 = vsub.f32 %v196_v0, %v197_v1  ;;  %s693_s20 = scalar_lea.hbm %s737_s2, %s322_s28  ;;  %s688_s14 = int_to_ptr.vmem [resolvable:$true] %s217_s14 }
  0x56   : > { %s204_s24 = scalar_lea.sflag [#allocation4], %s674_s5  ;;  %s436_s17 = scalar_lea.vmem %s688_s14, 128 }
  0x57   : > { %v199_v3 = vmul.f32 %v198_v2, %v198_v2  ;;  %p437_p6 = scmp.ne.s32.totalorder %s688_s14, %s436_s17  ;;  %p750_p13 = scmp.ne.s32.totalorder %s742_s21, 0 }
  0x58   : > { %s510_s13 = smov [#allocation7]  }
  0x59   : > { %202 = vst [vmem:[%s195_s29] sm:$0xff] %v199_v3  ;;  %p438_p7 = pnand %p437_p6, %p750_p13  ;;  %s440_s19 = sshll.u32 %s510_s13, 4  ;;  %s441_s19 = int_to_ptr.vmem [resolvable:$false] %s440_s19 }
  0x5a   : > { %s442_s23 = scalar_lea.vmem %s441_s19, 256  ;;  %p443_p8 = scmp.lt.s32.totalorder %s688_s14, %s441_s19 }
  0x5b   : > { %p439_p5 = pneg %p438_p7  ;;  %p444_p9 = scmp.lt.s32.totalorder %s442_s23, %s436_s17 }
  0x5d   : > { %p445_p0 = por %p444_p9, %p443_p8 }
  0x5f   : > { %p446_p1 = pnand %p445_p0, %p439_p5 }
  0x61   : > { %449 = shalt.err (!%p446_p1)
}
  0x62   : > { %s450_s25 = scalar_lea.hbm %s693_s20, 128  ;;  %s454_s5 = scalar_lea.hbm %s737_s2, 256 }
  0x63   : > { %p451_p11 = scmp.ne.s32.totalorder %s693_s20, %s450_s25  ;;  %p455_p4 = scmp.lt.u32.totalorder %s693_s20, %s737_s2 }
  0x64   : > { %p456_p10 = scmp.lt.u32.totalorder %s454_s5, %s450_s25  ;;  %p458_p6 = scmp.lt.u32.totalorder %s450_s25, %s693_s20 }
  0x65   : > { %p452_p12 = pnand %p451_p11, %p750_p13 }
  0x66   : > { %p457_p3 = por %p456_p10, %p455_p4 }
  0x67   : > { %p453_p2 = pneg %p452_p12 }
  0x68   : > { %p459_p7 = por %p458_p6, %p457_p3 }
  0x6a   : > { %p460_p5 = pnand %p459_p7, %p453_p2 }
  0x6c   : > { %463 = shalt.err (!%p460_p5)
}
  0x6d   : > { %329 = dma.vmem_to_hbm [thread:$0]  (%p750_p13), %s688_s14, 128, %s693_s20, %s204_s24  }
  0x6e PF: > { %s229_s30 = sand.u32 1, %s494_s9   ;;  %p751_p8 = scmp.ne.s32.totalorder %s743_s22, 0 }
  0x6f   : > { %p752_p9 = scmp.ge.s32.totalorder %s506_s12, 2  ;;  %s230_s3 = scalar_lea.sflag [#allocation4], %s229_s30 }
  0x71   : > { %p339_p0 = pnand %p752_p9, %p751_p8 }
  0x73   : > { %489 = dma.done.wait (!%p339_p0), %s230_s3, 128  }
  0x74   : > { %491 = vsyncadd (!%p339_p0), %s230_s3, 4294967168  ;;  %p18_p1 = scmp.ge.s32.totalorder %s551_s15, 4   ;;  %s753_s9 = smov %s498_s10 }
  0x75   : > { %s754_s10 = smov %s502_s11  ;;  %s755_s11 = smov %s563_s18 }
  0x76   : > { %s756_s12 = smov %s551_s15  ;;  %20 = sbr.rel (!%p18_p1) target bundleno = 7 (0x7), region = 86 }
  0x7d   :  { %235 = vsyncpa [#allocation3], 1 }
  0x7e   :  { %237 = vsyncpa [#allocation3 + $0x1], 1 }
  0x7f   :  { %238 = vsyncpa [#allocation6], 1 }
  0x80   :  { %240 = vsyncpa [#allocation6 + $0x1], 1 }
  0x81   :  { %241 = vsyncpa [#allocation4], 1 }
  0x82   :  { %243 = vsyncpa [#allocation4 + $0x1], 1 }

</bundles_post_ra>
